<compile_context>
chip_gen: v5e
topology: v5e:2x2
jax: 0.10.0
libtpu: 0.0.40
codegen_flags: <defaults>
</compile_context>

<pallas_src>
import functools

import jax
import jax.numpy as jnp
import numpy as np
from jax import lax
from jax.experimental import pallas as pl
from jax.experimental.pallas import tpu as pltpu


# ------------------------------- helpers -------------------------------------
def _round_up(a, b):
    return ((a + b - 1) // b) * b


def _pick_tm(outf, halo, c, oc_pad, *, vmem_budget_bytes=16 * 1024 * 1024, min_tiles=4):
    """Spatial tile (lanes): a multiple of `halo` (itself a multiple of 128),
    aiming for >= min_tiles tiles per image while fitting a conservative VMEM
    budget (16 MiB keeps us inside v5e's default scoped VMEM; v6e/v7x have more)."""
    def cost(tm):
        x_b = 2 * c * tm * 2          # x window, double-buffered, bf16
        h_b = 2 * c * halo * 2        # halo block, double-buffered, bf16
        o_b = 2 * oc_pad * tm * 2     # bf16 output, double-buffered
        acc = oc_pad * tm * 4         # f32 accumulator (value)
        xw = c * (tm + halo) * 2      # concatenated window (value)
        return x_b + h_b + o_b + acc + xw

    want = max(128, min(2048, _round_up(-(-outf // min_tiles), 128)))
    tm = _round_up(max(want, halo), halo)
    while tm > halo and cost(tm) > vmem_budget_bytes:
        tm -= halo
    return tm


# ----------------------------- Pallas kernel ----------------------------------
def _make_kernel(taps, tm):
    def kernel(x_ref, halo_ref, w_ref, shift_ref, o_ref):
        # x_ref:     (C, TM)        bf16  current flat spatial window
        # halo_ref:  (C, HALO)      bf16  the HALO elements following the window
        # w_ref:     (T, OC_pad, C) bf16  BN-scale-folded weight, one (OC,C) slab per tap
        # shift_ref: (OC_pad, 1)    f32   folded BN shift (beta - mean*scale [+ bias*scale])
        # o_ref:     (OC_pad, TM)   bf16  lane-dense output tile
        xw = jnp.concatenate([x_ref[...], halo_ref[...]], axis=-1)   # (C, TM+HALO)
        acc = None
        for t, off in enumerate(taps):          # static unrolled loop over KH*KW taps
            xs = xw[:, off:off + tm]            # static lane slice = fused im2col shift
            p = jnp.dot(w_ref[t], xs, preferred_element_type=jnp.float32)
            acc = p if acc is None else acc + p
        y = acc + shift_ref[...]                # per-channel shift (lane broadcast)
        o_ref[...] = jnp.maximum(y, 0.0).astype(o_ref.dtype)
    return kernel


def _fused_conv_bn_relu(x_flat, w_taps, shift_col, *, taps, tm, halo, n_tiles):
    N, C, _ = x_flat.shape
    T, OC_pad, _ = w_taps.shape
    ratio = tm // halo                      # halo | tm by construction
    kernel = _make_kernel(taps, tm)
    return pl.pallas_call(
        kernel,
        out_shape=jax.ShapeDtypeStruct((N, OC_pad, n_tiles * tm), jnp.bfloat16),
        grid_spec=pltpu.PrefetchScalarGridSpec(
            num_scalar_prefetch=0,
            grid=(N, n_tiles),
            in_specs=[
                # main spatial window for tile m of image n
                pl.BlockSpec((pl.Squeezed(), C, tm), lambda n, m: (n, 0, m)),
                # halo: the `halo` flat elements immediately after the window
                pl.BlockSpec((pl.Squeezed(), C, halo),
                             lambda n, m: (n, 0, (m + 1) * ratio)),
                # grid-invariant operands: single-buffered (no re-DMA, no 2x VMEM)
                pl.BlockSpec((T, OC_pad, C), lambda n, m: (0, 0, 0),
                             pipeline_mode=pl.Buffered(1)),
                pl.BlockSpec((OC_pad, 1), lambda n, m: (0, 0),
                             pipeline_mode=pl.Buffered(1)),
            ],
            out_specs=pl.BlockSpec((pl.Squeezed(), OC_pad, tm), lambda n, m: (n, 0, m)),
        ),
        compiler_params=pltpu.CompilerParams(
            dimension_semantics=("parallel", "parallel"),
            vmem_limit_bytes=32 * 1024 * 1024,
        ),
    )(x_flat, x_flat, w_taps, shift_col)


# ------------------------------- JAX glue -------------------------------------
@functools.partial(jax.jit, static_argnames=("stride", "padding", "dilation", "eps"))
def conv_bn_relu_forward(x, weight, gamma, beta, running_mean, running_var, bias=None,
                         *, stride=1, padding=0, dilation=1, eps=1e-5):
    """x: (N, C, H, W) NCHW; weight: (OC, C, KH, KW). Returns (N, OC, OH, OW) f32."""
    N, C, H, W = x.shape
    OC, _, KH, KW = weight.shape
    if stride != 1:
        # TODO(synk): stride > 1 needs strided lane slicing or host-side stride
        # compaction; the fused kernel currently implements stride == 1 only.
        raise NotImplementedError("Pallas conv_bn_relu kernel supports stride=1 only")

    Hp, Wp = H + 2 * padding, W + 2 * padding
    OH = Hp - dilation * (KH - 1)
    OW = Wp - dilation * (KW - 1)

    # Fold BatchNorm2d (inference / running stats): scale into the weight, shift
    # stays a separate f32 kernel input (optional conv bias folds into the shift).
    scale = gamma / jnp.sqrt(running_var + eps)            # (OC,)
    shift = beta - running_mean * scale
    if bias is not None:
        shift = shift + bias * scale
    OC_pad = _round_up(OC, 8)
    w_taps = (weight * scale[:, None, None, None]).transpose(2, 3, 0, 1)
    w_taps = w_taps.reshape(KH * KW, OC, C)                # tap t = kh*KW + kw
    w_taps = jnp.pad(w_taps, ((0, 0), (0, OC_pad - OC), (0, 0))).astype(jnp.bfloat16)
    shift_col = jnp.pad(shift, (0, OC_pad - OC)).reshape(OC_pad, 1).astype(jnp.float32)

    # x: cast to bf16 FIRST, then zero-pad spatially and flatten (pitch = Wp).
    xb = x.astype(jnp.bfloat16)
    x_pad = jnp.pad(xb, ((0, 0), (0, 0), (padding, padding), (padding, padding)))
    x_flat = x_pad.reshape(N, C, Hp * Wp)

    # Tiling: output keeps flat pitch Wp (implicit GEMM with tiny over-compute).
    outf = OH * Wp
    halo_needed = dilation * (KH - 1) * Wp + dilation * (KW - 1)
    halo = _round_up(max(halo_needed, 1), 128)
    tm = _pick_tm(outf, halo, C, OC_pad)
    n_tiles = -(-outf // tm)
    x_len = (n_tiles + 1) * tm                 # every window + its halo, zero-padded
    x_flat = jnp.pad(x_flat, ((0, 0), (0, 0), (0, x_len - Hp * Wp)))

    taps = tuple(kh * dilation * Wp + kw * dilation
                 for kh in range(KH) for kw in range(KW))

    out = _fused_conv_bn_relu(x_flat, w_taps, shift_col,
                              taps=taps, tm=tm, halo=halo, n_tiles=n_tiles)
    # Drop padded channels / flat positions, un-flatten, drop the Wp-OW garbage cols.
    out = out[:, :OC, :outf].reshape(N, OC, OH, Wp)[..., :OW]
    return out.astype(jnp.float32)


# ------------------------------- reference ------------------------------------
def _reference(x, weight, gamma, beta, running_mean, running_var,
               stride, padding, dilation, eps=1e-5):
    y = lax.conv_general_dilated(
        x, weight,
        window_strides=(stride, stride),
        padding=[(padding, padding), (padding, padding)],
        rhs_dilation=(dilation, dilation),
        dimension_numbers=("NCHW", "OIHW", "NCHW"))
    inv = gamma / jnp.sqrt(running_var + eps)
    y = y * inv[None, :, None, None] + (beta - running_mean * inv)[None, :, None, None]
    return jnp.maximum(y, 0.0)


# --------------------------------- main ----------------------------------------
if __name__ == "__main__":
    # Module config (synthetic, deterministic): Conv2d(4, 8, k=3, stride=1, pad=1), bias=False.
    N, C, H, W = 2, 4, 16, 16
    OC, KH, KW = 8, 3, 3
    stride, padding, dilation = 1, 1, 1

    key = jax.random.PRNGKey(0)
    kx, kw, kg, kb, km, kv = jax.random.split(key, 6)

    x = jax.random.normal(kx, (N, C, H, W), dtype=jnp.float32)
    weight = jax.random.normal(kw, (OC, C, KH, KW), dtype=jnp.float32) * 0.1
    gamma = 1.0 + 0.1 * jax.random.normal(kg, (OC,), dtype=jnp.float32)
    beta = 0.1 * jax.random.normal(kb, (OC,), dtype=jnp.float32)
    running_mean = 0.1 * jax.random.normal(km, (OC,), dtype=jnp.float32)
    running_var = jnp.abs(jax.random.normal(kv, (OC,), dtype=jnp.float32)) + 0.5

    out = conv_bn_relu_forward(
        x, weight, gamma, beta, running_mean, running_var,
        stride=stride, padding=padding, dilation=dilation)
    out = jax.block_until_ready(out)

    ref = _reference(x, weight, gamma, beta, running_mean, running_var,
                     stride, padding, dilation)
    # bf16 MXU inputs + bf16 output with f32 accumulation -> loosened tolerance.
    np.testing.assert_allclose(np.asarray(out), np.asarray(ref), rtol=4e-2, atol=4e-2)

    print("KERNEL_OK")
</pallas_src>

<mosaic_0001>
module attributes {stable_mosaic.version = 11 : i64} {
  func.func @kernel(%arg0: i32, %arg1: i32, %arg2: memref<1x4x128xbf16, #tpu.memory_space<vmem>>, %arg3: memref<1x4x128xbf16, #tpu.memory_space<vmem>>, %arg4: memref<9x8x4xbf16, #tpu.memory_space<vmem>>, %arg5: memref<8x1xf32, #tpu.memory_space<vmem>>, %arg6: memref<1x8x128xbf16, #tpu.memory_space<vmem>>) attributes {dimension_semantics = [#tpu.dimension_semantics<parallel>, #tpu.dimension_semantics<parallel>], iteration_bounds = array<i64: 2, 3>, scalar_prefetch = 0 : i64, scratch_operands = 0 : i64, tpu.core_type = #tpu.core_type<tc>, window_params = [{transform_indices = @transform_0, window_bounds = array<i64: 1, 4, 128>}, {transform_indices = @transform_1, window_bounds = array<i64: 1, 4, 128>}, {pipeline_mode = #tpu.pipeline_mode<synchronous>, transform_indices = @transform_2, window_bounds = array<i64: 9, 8, 4>}, {pipeline_mode = #tpu.pipeline_mode<synchronous>, transform_indices = @transform_3, window_bounds = array<i64: 8, 1>}, {transform_indices = @transform_4, window_bounds = array<i64: 1, 8, 128>}]} {
    %c0 = arith.constant 0 : index
    %c0_0 = arith.constant 0 : index
    %c0_1 = arith.constant 0 : index
    %0 = vector.load %arg2[%c0, %c0_0, %c0_1] : memref<1x4x128xbf16, #tpu.memory_space<vmem>>, vector<1x4x128xbf16>
    %1 = vector.shape_cast %0 : vector<1x4x128xbf16> to vector<4x128xbf16>
    %c0_2 = arith.constant 0 : index
    %c0_3 = arith.constant 0 : index
    %c0_4 = arith.constant 0 : index
    %2 = vector.load %arg3[%c0_2, %c0_3, %c0_4] : memref<1x4x128xbf16, #tpu.memory_space<vmem>>, vector<1x4x128xbf16>
    %3 = vector.shape_cast %2 : vector<1x4x128xbf16> to vector<4x128xbf16>
    %4 = tpu.concatenate %1, %3 in 1 : vector<4x128xbf16>, vector<4x128xbf16> -> vector<4x256xbf16>
    %5 = vector.extract_strided_slice %4 {offsets = [0, 0], sizes = [4, 128], strides = [1, 1]} : vector<4x256xbf16> to vector<4x128xbf16>
    %c0_5 = arith.constant 0 : index
    %c0_6 = arith.constant 0 : index
    %c0_7 = arith.constant 0 : index
    %6 = vector.load %arg4[%c0_5, %c0_6, %c0_7] : memref<9x8x4xbf16, #tpu.memory_space<vmem>>, vector<1x8x4xbf16>
    %7 = vector.shape_cast %6 : vector<1x8x4xbf16> to vector<8x4xbf16>
    %cst = arith.constant dense<0.000000e+00> : vector<8x128xf32>
    %8 = tpu.matmul %7, %5, %cst {dimension_numbers = #tpu.dot_dimension_numbers<[1], [0], [0], [1], [0, 0, 1, 1], [], []>} : vector<8x4xbf16>, vector<4x128xbf16>, vector<8x128xf32> -> vector<8x128xf32>
    %9 = vector.extract_strided_slice %4 {offsets = [0, 1], sizes = [4, 128], strides = [1, 1]} : vector<4x256xbf16> to vector<4x128xbf16>
    %c1 = arith.constant 1 : index
    %c0_8 = arith.constant 0 : index
    %c0_9 = arith.constant 0 : index
    %10 = vector.load %arg4[%c1, %c0_8, %c0_9] : memref<9x8x4xbf16, #tpu.memory_space<vmem>>, vector<1x8x4xbf16>
    %11 = vector.shape_cast %10 : vector<1x8x4xbf16> to vector<8x4xbf16>
    %cst_10 = arith.constant dense<0.000000e+00> : vector<8x128xf32>
    %12 = tpu.matmul %11, %9, %cst_10 {dimension_numbers = #tpu.dot_dimension_numbers<[1], [0], [0], [1], [0, 0, 1, 1], [], []>} : vector<8x4xbf16>, vector<4x128xbf16>, vector<8x128xf32> -> vector<8x128xf32>
    %13 = arith.addf %8, %12 : vector<8x128xf32>
    %14 = vector.extract_strided_slice %4 {offsets = [0, 2], sizes = [4, 128], strides = [1, 1]} : vector<4x256xbf16> to vector<4x128xbf16>
    %c2 = arith.constant 2 : index
    %c0_11 = arith.constant 0 : index
    %c0_12 = arith.constant 0 : index
    %15 = vector.load %arg4[%c2, %c0_11, %c0_12] : memref<9x8x4xbf16, #tpu.memory_space<vmem>>, vector<1x8x4xbf16>
    %16 = vector.shape_cast %15 : vector<1x8x4xbf16> to vector<8x4xbf16>
    %cst_13 = arith.constant dense<0.000000e+00> : vector<8x128xf32>
    %17 = tpu.matmul %16, %14, %cst_13 {dimension_numbers = #tpu.dot_dimension_numbers<[1], [0], [0], [1], [0, 0, 1, 1], [], []>} : vector<8x4xbf16>, vector<4x128xbf16>, vector<8x128xf32> -> vector<8x128xf32>
    %18 = arith.addf %13, %17 : vector<8x128xf32>
    %19 = vector.extract_strided_slice %4 {offsets = [0, 18], sizes = [4, 128], strides = [1, 1]} : vector<4x256xbf16> to vector<4x128xbf16>
    %c3 = arith.constant 3 : index
    %c0_14 = arith.constant 0 : index
    %c0_15 = arith.constant 0 : index
    %20 = vector.load %arg4[%c3, %c0_14, %c0_15] : memref<9x8x4xbf16, #tpu.memory_space<vmem>>, vector<1x8x4xbf16>
    %21 = vector.shape_cast %20 : vector<1x8x4xbf16> to vector<8x4xbf16>
    %cst_16 = arith.constant dense<0.000000e+00> : vector<8x128xf32>
    %22 = tpu.matmul %21, %19, %cst_16 {dimension_numbers = #tpu.dot_dimension_numbers<[1], [0], [0], [1], [0, 0, 1, 1], [], []>} : vector<8x4xbf16>, vector<4x128xbf16>, vector<8x128xf32> -> vector<8x128xf32>
    %23 = arith.addf %18, %22 : vector<8x128xf32>
    %24 = vector.extract_strided_slice %4 {offsets = [0, 19], sizes = [4, 128], strides = [1, 1]} : vector<4x256xbf16> to vector<4x128xbf16>
    %c4 = arith.constant 4 : index
    %c0_17 = arith.constant 0 : index
    %c0_18 = arith.constant 0 : index
    %25 = vector.load %arg4[%c4, %c0_17, %c0_18] : memref<9x8x4xbf16, #tpu.memory_space<vmem>>, vector<1x8x4xbf16>
    %26 = vector.shape_cast %25 : vector<1x8x4xbf16> to vector<8x4xbf16>
    %cst_19 = arith.constant dense<0.000000e+00> : vector<8x128xf32>
    %27 = tpu.matmul %26, %24, %cst_19 {dimension_numbers = #tpu.dot_dimension_numbers<[1], [0], [0], [1], [0, 0, 1, 1], [], []>} : vector<8x4xbf16>, vector<4x128xbf16>, vector<8x128xf32> -> vector<8x128xf32>
    %28 = arith.addf %23, %27 : vector<8x128xf32>
    %29 = vector.extract_strided_slice %4 {offsets = [0, 20], sizes = [4, 128], strides = [1, 1]} : vector<4x256xbf16> to vector<4x128xbf16>
    %c5 = arith.constant 5 : index
    %c0_20 = arith.constant 0 : index
    %c0_21 = arith.constant 0 : index
    %30 = vector.load %arg4[%c5, %c0_20, %c0_21] : memref<9x8x4xbf16, #tpu.memory_space<vmem>>, vector<1x8x4xbf16>
    %31 = vector.shape_cast %30 : vector<1x8x4xbf16> to vector<8x4xbf16>
    %cst_22 = arith.constant dense<0.000000e+00> : vector<8x128xf32>
    %32 = tpu.matmul %31, %29, %cst_22 {dimension_numbers = #tpu.dot_dimension_numbers<[1], [0], [0], [1], [0, 0, 1, 1], [], []>} : vector<8x4xbf16>, vector<4x128xbf16>, vector<8x128xf32> -> vector<8x128xf32>
    %33 = arith.addf %28, %32 : vector<8x128xf32>
    %34 = vector.extract_strided_slice %4 {offsets = [0, 36], sizes = [4, 128], strides = [1, 1]} : vector<4x256xbf16> to vector<4x128xbf16>
    %c6 = arith.constant 6 : index
    %c0_23 = arith.constant 0 : index
    %c0_24 = arith.constant 0 : index
    %35 = vector.load %arg4[%c6, %c0_23, %c0_24] : memref<9x8x4xbf16, #tpu.memory_space<vmem>>, vector<1x8x4xbf16>
    %36 = vector.shape_cast %35 : vector<1x8x4xbf16> to vector<8x4xbf16>
    %cst_25 = arith.constant dense<0.000000e+00> : vector<8x128xf32>
    %37 = tpu.matmul %36, %34, %cst_25 {dimension_numbers = #tpu.dot_dimension_numbers<[1], [0], [0], [1], [0, 0, 1, 1], [], []>} : vector<8x4xbf16>, vector<4x128xbf16>, vector<8x128xf32> -> vector<8x128xf32>
    %38 = arith.addf %33, %37 : vector<8x128xf32>
    %39 = vector.extract_strided_slice %4 {offsets = [0, 37], sizes = [4, 128], strides = [1, 1]} : vector<4x256xbf16> to vector<4x128xbf16>
    %c7 = arith.constant 7 : index
    %c0_26 = arith.constant 0 : index
    %c0_27 = arith.constant 0 : index
    %40 = vector.load %arg4[%c7, %c0_26, %c0_27] : memref<9x8x4xbf16, #tpu.memory_space<vmem>>, vector<1x8x4xbf16>
    %41 = vector.shape_cast %40 : vector<1x8x4xbf16> to vector<8x4xbf16>
    %cst_28 = arith.constant dense<0.000000e+00> : vector<8x128xf32>
    %42 = tpu.matmul %41, %39, %cst_28 {dimension_numbers = #tpu.dot_dimension_numbers<[1], [0], [0], [1], [0, 0, 1, 1], [], []>} : vector<8x4xbf16>, vector<4x128xbf16>, vector<8x128xf32> -> vector<8x128xf32>
    %43 = arith.addf %38, %42 : vector<8x128xf32>
    %44 = vector.extract_strided_slice %4 {offsets = [0, 38], sizes = [4, 128], strides = [1, 1]} : vector<4x256xbf16> to vector<4x128xbf16>
    %c8 = arith.constant 8 : index
    %c0_29 = arith.constant 0 : index
    %c0_30 = arith.constant 0 : index
    %45 = vector.load %arg4[%c8, %c0_29, %c0_30] : memref<9x8x4xbf16, #tpu.memory_space<vmem>>, vector<1x8x4xbf16>
    %46 = vector.shape_cast %45 : vector<1x8x4xbf16> to vector<8x4xbf16>
    %cst_31 = arith.constant dense<0.000000e+00> : vector<8x128xf32>
    %47 = tpu.matmul %46, %44, %cst_31 {dimension_numbers = #tpu.dot_dimension_numbers<[1], [0], [0], [1], [0, 0, 1, 1], [], []>} : vector<8x4xbf16>, vector<4x128xbf16>, vector<8x128xf32> -> vector<8x128xf32>
    %48 = arith.addf %43, %47 : vector<8x128xf32>
    %c0_32 = arith.constant 0 : index
    %c0_33 = arith.constant 0 : index
    %49 = vector.load %arg5[%c0_32, %c0_33] : memref<8x1xf32, #tpu.memory_space<vmem>>, vector<8x1xf32>
    %50 = vector.broadcast %49 : vector<8x1xf32> to vector<8x128xf32>
    %51 = arith.addf %48, %50 : vector<8x128xf32>
    %cst_34 = arith.constant 0.000000e+00 : f32
    %52 = vector.broadcast %cst_34 : f32 to vector<8x128xf32>
    %53 = arith.maximumf %51, %52 : vector<8x128xf32>
    %54 = arith.truncf %53 : vector<8x128xf32> to vector<8x128xbf16>
    %c0_35 = arith.constant 0 : index
    %c0_36 = arith.constant 0 : index
    %c0_37 = arith.constant 0 : index
    %55 = vector.load %arg6[%c0_35, %c0_36, %c0_37] : memref<1x8x128xbf16, #tpu.memory_space<vmem>>, vector<1x8x128xbf16>
    %56 = vector.shape_cast %55 : vector<1x8x128xbf16> to vector<8x128xbf16>
    %57 = vector.shape_cast %54 : vector<8x128xbf16> to vector<1x8x128xbf16>
    tpu.vector_store %arg6[%c0_35, %c0_36, %c0_37], %57 {strides = array<i32>} : memref<1x8x128xbf16, #tpu.memory_space<vmem>>, vector<1x8x128xbf16>,
    return
  }
  func.func @transform_0(%arg0: i32, %arg1: i32) -> (i32, i32, i32) {
    %c0_i32 = arith.constant 0 : i32
    %c0_i32_0 = arith.constant 0 : i32
    return %arg0, %c0_i32, %arg1 : i32, i32, i32
  }
  func.func @transform_1(%arg0: i32, %arg1: i32) -> (i32, i32, i32) {
    %c1_i32 = arith.constant 1 : i32
    %0 = arith.addi %arg1, %c1_i32 : i32
    %c1_i32_0 = arith.constant 1 : i32
    %1 = arith.muli %0, %c1_i32_0 : i32
    %c0_i32 = arith.constant 0 : i32
    %c0_i32_1 = arith.constant 0 : i32
    return %arg0, %c0_i32, %1 : i32, i32, i32
  }
  func.func @transform_2(%arg0: i32, %arg1: i32) -> (i32, i32, i32) {
    %c0_i32 = arith.constant 0 : i32
    %c0_i32_0 = arith.constant 0 : i32
    %c0_i32_1 = arith.constant 0 : i32
    %c0_i32_2 = arith.constant 0 : i32
    return %c0_i32, %c0_i32_0, %c0_i32_1 : i32, i32, i32
  }
  func.func @transform_3(%arg0: i32, %arg1: i32) -> (i32, i32) {
    %c0_i32 = arith.constant 0 : i32
    %c0_i32_0 = arith.constant 0 : i32
    %c0_i32_1 = arith.constant 0 : i32
    return %c0_i32, %c0_i32_0 : i32, i32
  }
  func.func @transform_4(%arg0: i32, %arg1: i32) -> (i32, i32, i32) {
    %c0_i32 = arith.constant 0 : i32
    %c0_i32_0 = arith.constant 0 : i32
    return %arg0, %c0_i32, %arg1 : i32, i32, i32
  }
}

</mosaic_0001>

<bundles_post_ra>
// kernel: conv_bn_relu_forward.1
= control target key start
LH: loop header
LB: loop body
LE: loop exit
PB: predicated region body
PF: predicated region fallthrough
CT: control target
= control target key end

     0   :  { %s786_s15 = smov 0   ;;  %s788_s16 = smov 0   ;;  %s899_s0 = inlined_call_operand.vmem [shape: bf16[2,4,512], index: 0, kind: input, shape index: {}, may-alias: {0,1}]   ;;  %s900_s1 = inlined_call_operand.vmem [shape: bf16[2,4,512], index: 1, kind: input, shape index: {}, may-alias: {0,1}]   ;;  %s901_s2 = inlined_call_operand.vmem [shape: bf16[9,8,4], index: 2, kind: input, shape index: {}]   ;;  %s902_s3 = inlined_call_operand.vmem [shape: f32[8,1], index: 3, kind: input, shape index: {}]   ;;  %s903_s4 = inlined_call_operand.vmem [shape: bf16[2,8,384], index: 4, kind: output, shape index: {}]  }
   0x1   :  { %s790_s17 = smov 0   ;;  %s792_s18 = smov 0  }
   0x2   :  { %s794_s19 = smov 0  }
   0x3 LB: > { %s23_s20 = sadd.s32 1, %s742_s17  ;;  %s26_s21 = sadd.s32 1, %s746_s18  ;;  %s750_s19 = sphi %s794_s19, %s14_s19   ;;  %s746_s18 = sphi %s792_s18, %s907_s18   ;;  %s742_s17 = sphi %s790_s17, %s906_s17   ;;  %s738_s16 = sphi %s788_s16, %s905_s16   ;;  %s734_s15 = sphi %s786_s15, %s904_s15  }
   0x4   : > { %p24_p0 = scmp.ge.s32.totalorder %s23_s20, 3  ;;  %p635_p1 = scmp.ge.s32.totalorder %s750_s19, 1 }
   0x5   : > { %p200_p2 = scmp.lt.s32.totalorder %s750_s19, 7 }
   0x6   : > { %s909_s20 = smov (%p24_p0, %s23_s20), 0  ;;  %s911_s21 = smov (!%p24_p0, %s26_s21), %s746_s18 }
   0x7   : > { %p201_p3 = pnand %p635_p1, %p200_p2  ;;  %p28_p4 = scmp.ge.s32.totalorder %s911_s21, 2 }
   0x8   : > { %p241_p5 = scmp.lt.s32.totalorder (!%p201_p3), %s738_s16, 1  ;;  %p243_p6 = scmp.lt.s32.totalorder (!%p201_p3), %s734_s15, 3 }
   0x9   : > { %s913_s21 = smov (%p28_p4, %s911_s21), 0  ;;  %204 = sbr.rel (%p201_p3) target bundleno = 316 (0x13c), region = 36 }
   0xa   : > { %s249_s24 = sadd.s32 (!%p201_p3), 1, %s734_s15  ;;  %s752_s30 = smov (!%p201_p3), 126  }
   0xb   : > { %p252_p7 = scmp.lt.s32.totalorder (!%p201_p3), %s249_s24, 3  ;;  %s753_s5 = smov (!%p201_p3), 127  }
   0xc   : > { %s754_s7 = smov (!%p201_p3), 110   ;;  %s755_s12 = smov (!%p201_p3), 109  }
   0xd   : > { %s756_s13 = smov (!%p201_p3), 92   ;;  %s757_s14 = smov (!%p201_p3), 91  }
   0xe   : > { %s915_s16 = smov (!%p241_p5, %s738_s16), 1  ;;  %s917_s24 = smov (!%p252_p7, %s249_s24), 3  ;;  %vm285_vm0 = vcmask 1041408   ;;  %vm281_vm1 = vcmask 31744   ;;  %v270_v4 = vld [vmem:[%s901_s2] sm:$0xf] }
   0xf   : > { %s244_s22 = scalar_select %p243_p6, %s734_s15, 3  ;;  %vm355_vm2 = vcmask 900096   ;;  %v646_v8 = vld [vmem:[%s901_s2 + $0xc] sm:$0xf]  ;;  %vm279_vm3 = vcmask 1039360   ;;  %vm327_vm4 = vcmask 1031168  }
  0x10   : > { %s636_s23 = sshll.u32 %s915_s16, 2  ;;  %v641_v17 = vld [vmem:[%s901_s2 + $0x4] sm:$0xf]  ;;  %v644_v18 = vld [vmem:[%s901_s2 + $0x8] sm:$0xf]  ;;  %vm383_vm5 = vcmask 891904  }
  0x11   : > { %s246_s25 = sadd.s32 %s636_s23, %s244_s22  ;;  %s255_s6 = sadd.s32 %s636_s23, %s917_s24  ;;  %v517_v20 = vld [vmem:[%s902_s3] sm:$0xff]  ;;  %v760_v21 = vmov 0   ;;  %vm439_vm6 = vcmask 752640   ;;  %vm467_vm7 = vcmask 744448   ;;  %v648_v33 = vld [vmem:[%s901_s2 + $0x10] sm:$0xf] }
  0x12   : > { %s637_s26 = sshll.u32 %s246_s25, 1  ;;  %s639_s8 = sshll.u32 %s255_s6, 1  ;;  %710 = vset.pattern.permute.xlu1 %v760_v21  ;;  %711 = vset.pattern.permute.xlu0 %v760_v21  ;;  %v652_v34 = vld [vmem:[%s901_s2 + $0x18] sm:$0xf]  ;;  %v654_v35 = vld [vmem:[%s901_s2 + $0x1c] sm:$0xf] }
  0x13   : > { %s248_s29 = scalar_lea.vmem %s899_s0, %s637_s26  ;;  %s257_s11 = scalar_lea.vmem %s900_s1, %s639_s8  ;;  %vm411_vm8 = vcmask 883712   ;;  %v650_v40 = vld [vmem:[%s901_s2 + $0x14] sm:$0xf]  ;;  %vm495_vm9 = vcmask 736256   ;;  %v656_v45 = vld [vmem:[%s901_s2 + $0x20] sm:$0xf] }
  0x14   : > { %v268_v0 = vld [vmem:[%s248_s29] sm:$0x3]  ;;  %s758_s22 = smov 108   ;;  %s759_s23 = smov 90  }
  0x15   : > { %323 = vrot.lane.b32.xlu1 %v268_v0, %s752_s30  ;;  %275 = vrot.lane.b32.xlu0 %v268_v0, %s753_s5  ;;  %v269_v1 = vld [vmem:[%s257_s11] sm:$0x3]  ;;  %v306_v3 = vsel %vm285_vm0, %v268_v0, 0  ;;  %p261_p8 = scmp.lt.s32.totalorder %s734_s15, 2  ;;  %s660_s25 = smul.u32 3, %s915_s16 }
  0x16   : > { %351 = vrot.lane.b32.xlu2 %v268_v0, %s754_s7  ;;  %315 = vmatpush.bf16.msra.mxu1 %v306_v3 }
  0x17   : > { %s919_s15 = smov (!%p261_p8, %s734_s15), 2 }
  0x18   : > { %s264_s26 = sadd.s32 %s660_s25, %s919_s15 }
  0x19   : > { %643 = vmatmul.msk.bf16.vlgmr.msra.gmra.mxu1 %vm281_vm1, %v270_v4  ;;  %s640_s27 = sshll.u32 %s264_s26, 2 }
  0x1d   : > { %325 = vrot.lane.b32.xlu1 %v269_v1, %s752_s30  ;;  %277 = vrot.lane.b32.xlu0 %v269_v1, %s753_s5  ;;  %s266_s30 = scalar_lea.vmem %s903_s4, %s640_s27 }
  0x1e   : > { %353 = vrot.lane.b32.xlu2 %v269_v1, %s754_s7 }
  0x25   : > { %381 = vrot.lane.b32.xlu1 %v269_v1, %s755_s12  ;;  %379 = vrot.lane.b32.xlu0 %v268_v0, %s755_s12 }
  0x26   : > { %435 = vrot.lane.b32.xlu2 %v268_v0, %s756_s13 }
  0x2d   : > { %463 = vrot.lane.b32.xlu1 %v268_v0, %s757_s14  ;;  %437 = vrot.lane.b32.xlu0 %v269_v1, %s756_s13 }
  0x2e   : > { %465 = vrot.lane.b32.xlu2 %v269_v1, %s757_s14 }
  0x35   : > { %409 = vrot.lane.b32.xlu1 %v269_v1, %s758_s22  ;;  %407 = vrot.lane.b32.xlu0 %v268_v0, %s758_s22 }
  0x36   : > { %491 = vrot.lane.b32.xlu2 %v268_v0, %s759_s23 }
  0x3d   : > { %493 = vrot.lane.b32.xlu0 %v269_v1, %s759_s23  ;;  %520 = vperm.xlu1 %710, %v517_v20  }
  0x70   : > { %v352_v2 = vpop.permute.xlu2 %351 }
  0x78   : > { %v354_v5 = vpop.permute.xlu2 %353 }
  0x79   : > { %v356_v6 = vsel %vm355_vm2, %v352_v2, %v354_v5 }
  0x7a   : > { %v361_v7 = vsel %vm285_vm0, %v356_v6, 0 }
  0x7b   : > { %370 = vmatpush.bf16.msra.mxu3 %v361_v7 }
  0x7e   : > { %647 = vmatmul.msk.bf16.vlgmr.msra.gmra.mxu3 %vm281_vm1, %v646_v8 }
  0x80   : > { %v436_v19 = vpop.permute.xlu2 %435 }
  0x87   : > { %v324_v9 = vpop.permute.xlu1 %323  ;;  %v276_v10 = vpop.permute.xlu0 %275 }
  0x88   : > { %v466_v26 = vpop.permute.xlu2 %465 }
  0x8f   : > { %v326_v11 = vpop.permute.xlu1 %325  ;;  %v278_v12 = vpop.permute.xlu0 %277 }
  0x90   : > { %v280_v13 = vsel %vm279_vm3, %v276_v10, %v278_v12  ;;  %v328_v14 = vsel %vm327_vm4, %v324_v9, %v326_v11  ;;  %v492_v41 = vpop.permute.xlu2 %491 }
  0x91   : > { %v287_v15 = vsel %vm285_vm0, %v280_v13, 0  ;;  %v333_v16 = vsel %vm285_vm0, %v328_v14, 0 }
  0x92   : > { %296 = vmatpush.bf16.msra.mxu0 %v287_v15  ;;  %342 = vmatpush.bf16.msra.mxu2 %v333_v16 }
  0x95   : > { %642 = vmatmul.msk.bf16.vlgmr.msra.gmra.mxu0 %vm281_vm1, %v641_v17  ;;  %645 = vmatmul.msk.bf16.vlgmr.msra.gmra.mxu2 %vm281_vm1, %v644_v18 }
  0x96   : > { %v317_v46 = vpop.f32.mrf.mxu1 }
  0x97   : > { %v382_v22 = vpop.permute.xlu1 %381  ;;  %v380_v23 = vpop.permute.xlu0 %379 }
  0x98   : > { %v384_v24 = vsel %vm383_vm5, %v380_v23, %v382_v22 }
  0x99   : > { %v389_v25 = vsel %vm285_vm0, %v384_v24, 0 }
  0x9a   : > { %398 = vmatpush.bf16.msrb.mxu0 %v389_v25 }
  0x9e   : > { %v319_v47 = vpop.f32.mrf.mxu1 }
  0x9f   : > { %v464_v27 = vpop.permute.xlu1 %463  ;;  %v438_v28 = vpop.permute.xlu0 %437 }
  0xa0   : > { %v440_v29 = vsel %vm439_vm6, %v436_v19, %v438_v28  ;;  %v468_v30 = vsel %vm467_vm7, %v464_v27, %v466_v26 }
  0xa1   : > { %v445_v31 = vsel %vm285_vm0, %v440_v29, 0  ;;  %v473_v32 = vsel %vm285_vm0, %v468_v30, 0 }
  0xa2   : > { %454 = vmatpush.bf16.msrb.mxu2 %v445_v31  ;;  %482 = vmatpush.bf16.msrb.mxu3 %v473_v32 }
  0xa5   : > { %649 = vmatmul.msk.bf16.vlgmr.msrb.gmra.mxu0 %vm281_vm1, %v648_v33  ;;  %653 = vmatmul.msk.bf16.vlgmr.msrb.gmra.mxu2 %vm281_vm1, %v652_v34 }
  0xa6   : > { %655 = vmatmul.msk.bf16.vlgmr.msrb.gmra.mxu3 %vm281_vm1, %v654_v35 }
  0xa7   : > { %v410_v36 = vpop.permute.xlu1 %409  ;;  %v408_v37 = vpop.permute.xlu0 %407 }
  0xa8   : > { %v412_v38 = vsel %vm411_vm8, %v408_v37, %v410_v36 }
  0xa9   : > { %v417_v39 = vsel %vm285_vm0, %v412_v38, 0 }
  0xaa   : > { %426 = vmatpush.bf16.msrb.mxu1 %v417_v39 }
  0xad   : > { %651 = vmatmul.msk.bf16.vlgmr.msrb.gmra.mxu1 %vm281_vm1, %v650_v40 }
  0xaf   : > { %v494_v42 = vpop.permute.xlu0 %493  ;;  %v521_v3 = vpop.permute.xlu1 %520 }
  0xb0   : > { %v496_v43 = vsel %vm495_vm9, %v492_v41, %v494_v42 }
  0xb1   : > { %v501_v44 = vsel %vm285_vm0, %v496_v43, 0 }
  0xb2   : > { %510 = vmatpush.bf16.msra.mxu0 %v501_v44 }
  0xb5   : > { %657 = vmatmul.msk.bf16.vlgmr.msra.gmra.mxu0 %vm281_vm1, %v656_v45 }
 0x101   : > { %v372_v48 = vpop.f32.mrf.mxu3 }
 0x109   : > { %v374_v49 = vpop.f32.mrf.mxu3 }
 0x112   : > { %v298_v50 = vpop.f32.mrf.mxu0 }
 0x113   : > { %v318_v54 = vadd.f32 %v317_v46, %v298_v50 }
 0x118   : > { %v344_v51 = vpop.f32.mrf.mxu2 }
 0x119   : > { %v348_v56 = vadd.f32 %v344_v51, %v318_v54 }
 0x11a   : > { %v300_v52 = vpop.f32.mrf.mxu0 }
 0x11b   : > { %v376_v57 = vadd.f32 %v372_v48, %v348_v56 }
 0x120   : > { %v346_v53 = vpop.f32.mrf.mxu2 }
 0x122   : > { %v400_v55 = vpop.f32.mrf.mxu0 }
 0x123   : > { %v404_v59 = vadd.f32 %v400_v55, %v376_v57 }
 0x128   : > { %v456_v58 = vpop.f32.mrf.mxu2 }
 0x129   : > { %v484_v60 = vpop.f32.mrf.mxu3 }
 0x12a   : > { %v402_v61 = vpop.f32.mrf.mxu0  ;;  %v428_v62 = vpop.f32.mrf.mxu1 }
 0x12b   : > { %v432_v63 = vadd.f32 %v428_v62, %v404_v59 }
 0x12d   : > { %v460_v0 = vadd.f32 %v456_v58, %v432_v63 }
 0x12f   : > { %v488_v2 = vadd.f32 %v484_v60, %v460_v0 }
 0x130   : > { %v458_v1 = vpop.f32.mrf.mxu2 }
 0x131   : > { %v486_v4 = vpop.f32.mrf.mxu3 }
 0x132   : > { %v512_v5 = vpop.f32.mrf.mxu0  ;;  %v430_v6 = vpop.f32.mrf.mxu1 }
 0x133   : > { %v516_v7 = vadd.f32 %v512_v5, %v488_v2 }
 0x135   : > { %v523_v8 = vadd.f32 %v521_v3, %v516_v7 }
 0x137   : > { %v524_v9 = vmax.f32 %v523_v8, 0.0 }
 0x139   : > { %v525_v10 = vpack.c.bf16 %v524_v9, %v524_v9 }
 0x13a   : > { %v514_v11 = vpop.f32.mrf.mxu0 }
 0x13b   : > { %526 = vst [vmem:[%s266_s30] sm:$0xf] %v525_v10 }
 0x13c PF: > { %s14_s19 = sadd.s32 1, %s750_s19   ;;  %s904_s15 = smov %s742_s17 }
 0x13d   : > { %p11_p9 = scmp.ge.s32.totalorder %s14_s19, 8   ;;  %s905_s16 = smov %s746_s18 }
 0x13e   : > { %s906_s17 = smov %s909_s20  ;;  %s907_s18 = smov %s913_s21 }
 0x13f   :  { %13 = sbr.rel (!%p11_p9) target bundleno = 3 (0x3), region = 77 }

</bundles_post_ra>
